<compile_context>
chip_gen: v7x
topology: tpu7x:2x2x1
jax: 0.10.0
libtpu: 0.0.40
codegen_flags: <defaults>
</compile_context>

<pallas_src>
import jax
import jax.numpy as jnp
from jax.experimental import pallas as pl
from jax.experimental.pallas import tpu as pltpu


def identity(x: jax.Array) -> jax.Array:
    """nn.Identity forward: a true no-op (no copy, no kernel launch)."""
    return x


# ~2 MiB per DMA chunk keeps a handful of concurrent descriptors in flight for
# multi-MiB inputs; small inputs go through a single full-array DMA.
_CHUNK_TARGET_BYTES = 2 * 1024 * 1024
_MAX_CHUNKS = 8


def _chunk_plan(leading: int, total_bytes: int):
    """Static (start, size) chunks along the leading axis."""
    if leading <= 1 or total_bytes <= _CHUNK_TARGET_BYTES:
        return [(0, leading)]
    n = min(leading, _MAX_CHUNKS,
            max(1, pl.cdiv(total_bytes, _CHUNK_TARGET_BYTES)))
    base, rem = divmod(leading, n)
    plan, start = [], 0
    for i in range(n):
        size = base + (1 if i < rem else 0)
        plan.append((start, size))
        start += size
    return plan


def _build_dma_copy_kernel(chunks):
    """Kernel: issue one HBM->HBM DMA per (static) chunk, then wait for all."""
    n_chunks = len(chunks)

    def kernel(x_hbm, o_hbm, sems):
        copies = []
        for i, (start, size) in enumerate(chunks):
            if n_chunks == 1:
                src, dst = x_hbm, o_hbm          # full-array copy
            else:
                # Static leading-axis slice: never splits the (tiled) minor
                # dims, so no alignment/masking concerns for any dtype.
                src = x_hbm.at[pl.ds(start, size)]
                dst = o_hbm.at[pl.ds(start, size)]
            cp = pltpu.make_async_copy(src, dst, sems.at[i])
            cp.start()                            # all chunks in flight
            copies.append(cp)
        for cp in copies:                         # then drain
            cp.wait()

    return kernel


def identity_materialize(x: jax.Array) -> jax.Array:
    """Identity that materializes a fresh copy of `x` via direct HBM->HBM DMA.

    Works for any shape/dtype with no padding, no reshapes of the payload and
    no VMEM staging: the kernel sees raw HBM refs (memory_space=pl.ANY) and
    copies them with one or a few concurrent async DMAs.
    """
    if x.size == 0:
        return x

    orig_ndim = x.ndim
    x_nd = x.reshape(1) if orig_ndim == 0 else x   # 0-d: free metadata reshape

    leading = x_nd.shape[0]
    total_bytes = x_nd.size * jnp.dtype(x_nd.dtype).itemsize
    chunks = _chunk_plan(leading, total_bytes)
    n_chunks = len(chunks)

    out = pl.pallas_call(
        _build_dma_copy_kernel(chunks),
        out_shape=jax.ShapeDtypeStruct(x_nd.shape, x_nd.dtype),
        in_specs=[pl.BlockSpec(memory_space=pl.ANY)],
        out_specs=pl.BlockSpec(memory_space=pl.ANY),
        scratch_shapes=[pltpu.SemaphoreType.DMA((n_chunks,))],
    )(x_nd)

    return out.reshape(()) if orig_ndim == 0 else out


if __name__ == "__main__":
    key = jax.random.PRNGKey(0)
    k0, k1, k2, k3 = jax.random.split(key, 4)

    # Small NCHW input consistent with the module's usage in a conv network.
    x = jax.random.normal(k0, (2, 4, 16, 16), dtype=jnp.float32)

    # 1) Primary path: true no-op (the Identity forward).
    y0 = identity(x)
    jax.block_until_ready(y0)
    assert y0.shape == x.shape and y0.dtype == x.dtype
    assert bool(jnp.all(y0 == x)), "no-op identity mismatch"

    # 2) Pallas DMA path on the small input (single full-array DMA).
    y1 = identity_materialize(x)
    jax.block_until_ready(y1)
    assert y1.shape == x.shape and y1.dtype == x.dtype
    assert bool(jnp.all(y1 == x)), "pallas identity mismatch (small)"

    # 3) Larger input (4 MiB) to exercise the multi-chunk concurrent-DMA path.
    x_big = jax.random.normal(k1, (4, 16, 128, 128), dtype=jnp.float32)
    y2 = identity_materialize(x_big)
    jax.block_until_ready(y2)
    assert bool(jnp.all(y2 == x_big)), "pallas identity mismatch (multi-chunk)"

    # 4) Ragged, non-tile-aligned shape: no pad / no slice passes anymore.
    x_odd = jax.random.normal(k2, (3, 5, 7), dtype=jnp.float32)
    y3 = identity_materialize(x_odd)
    jax.block_until_ready(y3)
    assert y3.shape == x_odd.shape and y3.dtype == x_odd.dtype
    assert bool(jnp.all(y3 == x_odd)), "pallas identity mismatch (ragged)"

    # 5) Sub-32-bit dtype (bf16) goes through the same native-layout DMA.
    x_bf16 = jax.random.normal(k3, (2, 8, 16, 32), dtype=jnp.float32).astype(
        jnp.bfloat16)
    y4 = identity_materialize(x_bf16)
    jax.block_until_ready(y4)
    assert y4.shape == x_bf16.shape and y4.dtype == jnp.bfloat16
    assert bool(jnp.all(y4 == x_bf16)), "pallas identity mismatch (bf16)"

    print("KERNEL_OK")
</pallas_src>

<mosaic_0001>
module attributes {stable_mosaic.version = 11 : i64} {
  func.func @kernel(%arg0: memref<2x4x16x16xf32, #tpu.memory_space<any>>, %arg1: memref<2x4x16x16xf32, #tpu.memory_space<any>>, %arg2: memref<1x!tpu.dma_semaphore, #tpu.memory_space<semaphore_mem>>) attributes {dimension_semantics = [], scalar_prefetch = 0 : i64, scratch_operands = 1 : i64, tpu.core_type = #tpu.core_type<tc>} {
    %c0_i32 = arith.constant 0 : i32
    %0 = tpu.memref_slice %arg2[%c0_i32] : memref<1x!tpu.dma_semaphore, #tpu.memory_space<semaphore_mem>> -> memref<1x!tpu.dma_semaphore, #tpu.memory_space<semaphore_mem>>
    %1 = tpu.memref_squeeze %0 : memref<1x!tpu.dma_semaphore, #tpu.memory_space<semaphore_mem>> -> memref<!tpu.dma_semaphore, #tpu.memory_space<semaphore_mem>>
    tpu.enqueue_dma source(%arg0 : memref<2x4x16x16xf32, #tpu.memory_space<any>>) target(%arg1 : memref<2x4x16x16xf32, #tpu.memory_space<any>>) target_semaphore(%1 : memref<!tpu.dma_semaphore, #tpu.memory_space<semaphore_mem>>)
    %c0_i32_0 = arith.constant 0 : i32
    %2 = tpu.memref_slice %arg2[%c0_i32_0] : memref<1x!tpu.dma_semaphore, #tpu.memory_space<semaphore_mem>> -> memref<1x!tpu.dma_semaphore, #tpu.memory_space<semaphore_mem>>
    %3 = tpu.memref_squeeze %2 : memref<1x!tpu.dma_semaphore, #tpu.memory_space<semaphore_mem>> -> memref<!tpu.dma_semaphore, #tpu.memory_space<semaphore_mem>>
    tpu.wait_dma2 semaphore(%3 : memref<!tpu.dma_semaphore, #tpu.memory_space<semaphore_mem>>) src(%arg0 : memref<2x4x16x16xf32, #tpu.memory_space<any>>) dst(%arg1 : memref<2x4x16x16xf32, #tpu.memory_space<any>>)
    return
  }
}

</mosaic_0001>

<bundles_post_ra>
// kernel: tpu_custom_call.1
= control target key start
LH: loop header
LB: loop body
LE: loop exit
PB: predicated region body
PF: predicated region fallthrough
CT: control target
= control target key end

     0   :  { %s36_s6 = smov [#allocation2]   ;;  %s37_s7 = smov [#allocation3]   ;;  %s55_s0 = inlined_call_operand.hbm [shape: f32[2,4,16,16], index: 0, kind: input, shape index: {}]   ;;  %s56_s1 = inlined_call_operand.hbm [shape: f32[2,4,16,16], index: 1, kind: output, shape index: {}]  }
   0x1   :  { %s38_s8 = smov 0  }
   0x2   :  { %18 = dma.general %s55_s0, 2048, %s56_s1, %s36_s6, %s37_s7, [#allocation4], %s38_s8, 0  }
   0x3   :  { %34 = dma.done.wait [#allocation2], 2048 }
   0x4   :  { %35 = vsyncadd [#allocation2], 4294965248 }
   0x5   :  { %24 = vsyncmov [#allocation2] }
   0x8   :  { %s25_s13 = vpop.sfrf %24 }
   0x9   :  { %p30_p0 = scmp.ne.s32.totalorder %s25_s13, 0 }
   0xb   :  { %29 = shalt.err (%p30_p0)  }

</bundles_post_ra>
